<compile_context>
chip_gen: v5e
topology: v5e:2x2
jax: 0.10.0
libtpu: 0.0.40
codegen_flags: <defaults>
</compile_context>

<pallas_src>
import functools

import jax
import jax.numpy as jnp
from jax import lax
from jax.experimental import pallas as pl
from jax.experimental.pallas import tpu as pltpu


# ----------------------------------------------------------------------------
# Fused Pallas kernel: qkv projection + pooled attention + output projection
# ----------------------------------------------------------------------------
def _mhpa_fused_kernel(x_ref, wqkv_ref, wproj_ref, bproj_ref, o_ref, *,
                       num_heads, head_dim, scale, has_cls, residual_pooling):
    # x_ref:     (1, N, C)
    # wqkv_ref:  (C, 3*dim_v)   columns ordered [q | k | v], each [head, head_dim]
    # wproj_ref: (dim_v, dim_v)
    # bproj_ref: (1, dim_v)
    # o_ref:     (1, N, dim_v)
    x = x_ref[0]                                                   # (N, C)
    dim_v = num_heads * head_dim

    # qkv = x @ w_qkv   (qkv_bias=False -> no bias add)
    qkv = jnp.dot(x, wqkv_ref[...], preferred_element_type=jnp.float32)  # (N, 3*dim_v)

    head_outs = []
    for h in range(num_heads):                     # static unroll (num_heads small)
        q = qkv[:, h * head_dim:(h + 1) * head_dim]                    # (N, D)
        k = qkv[:, dim_v + h * head_dim: dim_v + (h + 1) * head_dim]   # (N, D)
        v = qkv[:, 2 * dim_v + h * head_dim: 2 * dim_v + (h + 1) * head_dim]

        # attn = (q*scale) @ k^T  -- contract last dims, no explicit k transpose.
        s = lax.dot_general(q * scale, k,
                            dimension_numbers=(((1,), (1,)), ((), ())),
                            preferred_element_type=jnp.float32)        # (N, N)

        # softmax (normalization folded into the p@v epilogue as a row scale)
        s = s - jnp.max(s, axis=-1, keepdims=True)
        p = jnp.exp(s)
        inv_denom = pl.reciprocal(jnp.sum(p, axis=-1, keepdims=True), approx=True)

        out = jnp.dot(p, v, preferred_element_type=jnp.float32) * inv_denom  # (N, D)

        if residual_pooling:
            # x[:, :, 1:, :] += q[:, :, 1:, :]  (skip cls row; residual uses UNSCALED q)
            start = 1 if has_cls else 0
            row = lax.broadcasted_iota(jnp.int32, out.shape, 0)
            out = jnp.where(row >= start, out + q, out)

        head_outs.append(out)

    # x = x.transpose(1, 2).reshape(B, -1, dim_out)  -> heads packed along lanes
    attn_out = jnp.concatenate(head_outs, axis=-1)                 # (N, dim_v)

    # x = self.proj(x)
    y = jnp.dot(attn_out, wproj_ref[...],
                preferred_element_type=jnp.float32) + bproj_ref[...]
    o_ref[0] = y.astype(o_ref.dtype)


def mhpa_forward(x, hw_shape, params, *, num_heads, has_cls_embed=True,
                 residual_pooling=True):
    """x: (B, N, C) with N = 1 (cls) + H*W. Returns (B, N, dim_v)."""
    del hw_shape  # pooling disabled in this config -> identity, hw unchanged
    B, N, C = x.shape
    dim_v = params["w_proj"].shape[0]
    head_dim = dim_v // num_heads
    scale = head_dim ** (-0.5)

    kern = functools.partial(
        _mhpa_fused_kernel,
        num_heads=num_heads, head_dim=head_dim, scale=scale,
        has_cls=has_cls_embed, residual_pooling=residual_pooling,
    )
    return pl.pallas_call(
        kern,
        out_shape=jax.ShapeDtypeStruct((B, N, dim_v), x.dtype),
        grid=(B,),
        in_specs=[
            pl.BlockSpec((1, N, C), lambda b: (b, 0, 0)),
            pl.BlockSpec((C, 3 * dim_v), lambda b: (0, 0)),
            pl.BlockSpec((dim_v, dim_v), lambda b: (0, 0)),
            pl.BlockSpec((1, dim_v), lambda b: (0, 0)),
        ],
        out_specs=pl.BlockSpec((1, N, dim_v), lambda b: (b, 0, 0)),
        compiler_params=pltpu.CompilerParams(dimension_semantics=("parallel",)),
    )(x, params["w_qkv"], params["w_proj"], params["b_proj"])


# ----------------------------------------------------------------------------
# Pure-JAX reference for correctness checking.
# ----------------------------------------------------------------------------
def mhpa_reference(x, params, *, num_heads, has_cls_embed=True):
    B, N, _ = x.shape
    dim_v = params["w_proj"].shape[0]
    head_dim = dim_v // num_heads
    scale = head_dim ** (-0.5)
    qkv = x @ params["w_qkv"]                                     # qkv_bias=False
    qkv = qkv.reshape(B, N, 3, num_heads, head_dim).transpose(2, 0, 3, 1, 4)
    q, k, v = qkv[0], qkv[1], qkv[2]
    attn = (q * scale) @ jnp.swapaxes(k, -2, -1)
    attn = jax.nn.softmax(attn, axis=-1)
    o = attn @ v
    if has_cls_embed:
        o = o.at[:, :, 1:, :].add(q[:, :, 1:, :])
    else:
        o = o + q
    o = jnp.transpose(o, (0, 2, 1, 3)).reshape(B, N, dim_v)
    return o @ params["w_proj"] + params["b_proj"]


if __name__ == "__main__":
    # Small deterministic config: dim_c = dim_v = 32, 4 heads, 4x4 patches + cls.
    B = 2
    dim_c = 32
    dim_v = 32
    num_heads = 4
    H = W = 4
    N = H * W + 1  # cls token

    key = jax.random.PRNGKey(0)
    k_qkv, k_proj_w, k_proj_b, k_x = jax.random.split(key, 4)

    params = {
        "w_qkv": 0.02 * jax.random.normal(k_qkv, (dim_c, 3 * dim_v), jnp.float32),
        "w_proj": 0.02 * jax.random.normal(k_proj_w, (dim_v, dim_v), jnp.float32),
        "b_proj": 0.02 * jax.random.normal(k_proj_b, (1, dim_v), jnp.float32),
    }
    x = jax.random.normal(k_x, (B, N, dim_c), jnp.float32)

    out = mhpa_forward(x, (H, W), params, num_heads=num_heads,
                       has_cls_embed=True, residual_pooling=True)
    out = jax.block_until_ready(out)

    ref = mhpa_reference(x, params, num_heads=num_heads, has_cls_embed=True)
    assert out.shape == (B, N, dim_v)
    # approx reciprocal (EUP) -> slightly looser tolerance than exact-div version
    assert jnp.allclose(out, ref, atol=1e-3, rtol=1e-3), \
        f"max abs err = {jnp.max(jnp.abs(out - ref))}"

    print("KERNEL_OK")
</pallas_src>

<mosaic_0001>
module attributes {stable_mosaic.version = 11 : i64} {
  func.func @_mhpa_fused_kernel(%arg0: i32, %arg1: memref<1x17x32xf32, #tpu.memory_space<vmem>>, %arg2: memref<32x96xf32, #tpu.memory_space<vmem>>, %arg3: memref<32x32xf32, #tpu.memory_space<vmem>>, %arg4: memref<1x32xf32, #tpu.memory_space<vmem>>, %arg5: memref<1x17x32xf32, #tpu.memory_space<vmem>>) attributes {dimension_semantics = [#tpu.dimension_semantics<parallel>], iteration_bounds = array<i64: 2>, scalar_prefetch = 0 : i64, scratch_operands = 0 : i64, tpu.core_type = #tpu.core_type<tc>, window_params = [{transform_indices = @transform_0, window_bounds = array<i64: 1, 17, 32>}, {pipeline_mode = #tpu.pipeline_mode<synchronous>, transform_indices = @transform_1, window_bounds = array<i64: 32, 96>}, {pipeline_mode = #tpu.pipeline_mode<synchronous>, transform_indices = @transform_2, window_bounds = array<i64: 32, 32>}, {pipeline_mode = #tpu.pipeline_mode<synchronous>, transform_indices = @transform_3, window_bounds = array<i64: 1, 32>}, {transform_indices = @transform_4, window_bounds = array<i64: 1, 17, 32>}]} {
    %c0 = arith.constant 0 : index
    %c0_0 = arith.constant 0 : index
    %c0_1 = arith.constant 0 : index
    %0 = vector.load %arg1[%c0, %c0_0, %c0_1] : memref<1x17x32xf32, #tpu.memory_space<vmem>>, vector<1x17x32xf32>
    %1 = vector.shape_cast %0 : vector<1x17x32xf32> to vector<17x32xf32>
    %c0_2 = arith.constant 0 : index
    %c0_3 = arith.constant 0 : index
    %2 = vector.load %arg2[%c0_2, %c0_3] : memref<32x96xf32, #tpu.memory_space<vmem>>, vector<32x96xf32>
    %cst = arith.constant dense<0.000000e+00> : vector<17x96xf32>
    %3 = tpu.matmul %1, %2, %cst {dimension_numbers = #tpu.dot_dimension_numbers<[1], [0], [0], [1], [0, 0, 1, 1], [], []>} : vector<17x32xf32>, vector<32x96xf32>, vector<17x96xf32> -> vector<17x96xf32>
    %4 = vector.extract_strided_slice %3 {offsets = [0, 0], sizes = [17, 8], strides = [1, 1]} : vector<17x96xf32> to vector<17x8xf32>
    %5 = vector.extract_strided_slice %3 {offsets = [0, 32], sizes = [17, 8], strides = [1, 1]} : vector<17x96xf32> to vector<17x8xf32>
    %6 = vector.extract_strided_slice %3 {offsets = [0, 64], sizes = [17, 8], strides = [1, 1]} : vector<17x96xf32> to vector<17x8xf32>
    %cst_4 = arith.constant 0.353553385 : f32
    %7 = vector.broadcast %cst_4 : f32 to vector<17x8xf32>
    %8 = arith.mulf %4, %7 : vector<17x8xf32>
    %cst_5 = arith.constant dense<0.000000e+00> : vector<17x17xf32>
    %9 = tpu.matmul %8, %5, %cst_5 {dimension_numbers = #tpu.dot_dimension_numbers<[1], [1], [0], [0], [0, 0, 1, 0], [], []>} : vector<17x8xf32>, vector<17x8xf32>, vector<17x17xf32> -> vector<17x17xf32>
    %cst_6 = arith.constant dense<0xFF800000> : vector<17xf32>
    %10 = vector.multi_reduction <maximumf>, %9, %cst_6 [1] : vector<17x17xf32> to vector<17xf32>
    %11 = vector.shape_cast %10 : vector<17xf32> to vector<17x1xf32>
    %12 = vector.broadcast %11 : vector<17x1xf32> to vector<17x17xf32>
    %13 = arith.subf %9, %12 : vector<17x17xf32>
    %14 = math.exp %13 : vector<17x17xf32>
    %cst_7 = arith.constant dense<0.000000e+00> : vector<17xf32>
    %15 = vector.multi_reduction <add>, %14, %cst_7 [1] : vector<17x17xf32> to vector<17xf32>
    %16 = vector.shape_cast %15 : vector<17xf32> to vector<17x1xf32>
    %17 = tpu.reciprocal %16 {approx = true} : vector<17x1xf32> -> vector<17x1xf32>
    %cst_8 = arith.constant dense<0.000000e+00> : vector<17x8xf32>
    %18 = tpu.matmul %14, %6, %cst_8 {dimension_numbers = #tpu.dot_dimension_numbers<[1], [0], [0], [1], [0, 0, 1, 1], [], []>} : vector<17x17xf32>, vector<17x8xf32>, vector<17x8xf32> -> vector<17x8xf32>
    %19 = vector.broadcast %17 : vector<17x1xf32> to vector<17x8xf32>
    %20 = arith.mulf %18, %19 : vector<17x8xf32>
    %21 = tpu.iota {dimensions = array<i32: 0>} : vector<17x8xi32>
    %c1_i32 = arith.constant 1 : i32
    %22 = vector.broadcast %c1_i32 : i32 to vector<17x8xi32>
    %23 = arith.cmpi sge, %21, %22 : vector<17x8xi32>
    %24 = arith.addf %20, %4 : vector<17x8xf32>
    %25 = arith.select %23, %24, %20 : vector<17x8xi1>, vector<17x8xf32>
    %26 = vector.extract_strided_slice %3 {offsets = [0, 8], sizes = [17, 8], strides = [1, 1]} : vector<17x96xf32> to vector<17x8xf32>
    %27 = vector.extract_strided_slice %3 {offsets = [0, 40], sizes = [17, 8], strides = [1, 1]} : vector<17x96xf32> to vector<17x8xf32>
    %28 = vector.extract_strided_slice %3 {offsets = [0, 72], sizes = [17, 8], strides = [1, 1]} : vector<17x96xf32> to vector<17x8xf32>
    %cst_9 = arith.constant 0.353553385 : f32
    %29 = vector.broadcast %cst_9 : f32 to vector<17x8xf32>
    %30 = arith.mulf %26, %29 : vector<17x8xf32>
    %cst_10 = arith.constant dense<0.000000e+00> : vector<17x17xf32>
    %31 = tpu.matmul %30, %27, %cst_10 {dimension_numbers = #tpu.dot_dimension_numbers<[1], [1], [0], [0], [0, 0, 1, 0], [], []>} : vector<17x8xf32>, vector<17x8xf32>, vector<17x17xf32> -> vector<17x17xf32>
    %cst_11 = arith.constant dense<0xFF800000> : vector<17xf32>
    %32 = vector.multi_reduction <maximumf>, %31, %cst_11 [1] : vector<17x17xf32> to vector<17xf32>
    %33 = vector.shape_cast %32 : vector<17xf32> to vector<17x1xf32>
    %34 = vector.broadcast %33 : vector<17x1xf32> to vector<17x17xf32>
    %35 = arith.subf %31, %34 : vector<17x17xf32>
    %36 = math.exp %35 : vector<17x17xf32>
    %cst_12 = arith.constant dense<0.000000e+00> : vector<17xf32>
    %37 = vector.multi_reduction <add>, %36, %cst_12 [1] : vector<17x17xf32> to vector<17xf32>
    %38 = vector.shape_cast %37 : vector<17xf32> to vector<17x1xf32>
    %39 = tpu.reciprocal %38 {approx = true} : vector<17x1xf32> -> vector<17x1xf32>
    %cst_13 = arith.constant dense<0.000000e+00> : vector<17x8xf32>
    %40 = tpu.matmul %36, %28, %cst_13 {dimension_numbers = #tpu.dot_dimension_numbers<[1], [0], [0], [1], [0, 0, 1, 1], [], []>} : vector<17x17xf32>, vector<17x8xf32>, vector<17x8xf32> -> vector<17x8xf32>
    %41 = vector.broadcast %39 : vector<17x1xf32> to vector<17x8xf32>
    %42 = arith.mulf %40, %41 : vector<17x8xf32>
    %43 = tpu.iota {dimensions = array<i32: 0>} : vector<17x8xi32>
    %c1_i32_14 = arith.constant 1 : i32
    %44 = vector.broadcast %c1_i32_14 : i32 to vector<17x8xi32>
    %45 = arith.cmpi sge, %43, %44 : vector<17x8xi32>
    %46 = arith.addf %42, %26 : vector<17x8xf32>
    %47 = arith.select %45, %46, %42 : vector<17x8xi1>, vector<17x8xf32>
    %48 = vector.extract_strided_slice %3 {offsets = [0, 16], sizes = [17, 8], strides = [1, 1]} : vector<17x96xf32> to vector<17x8xf32>
    %49 = vector.extract_strided_slice %3 {offsets = [0, 48], sizes = [17, 8], strides = [1, 1]} : vector<17x96xf32> to vector<17x8xf32>
    %50 = vector.extract_strided_slice %3 {offsets = [0, 80], sizes = [17, 8], strides = [1, 1]} : vector<17x96xf32> to vector<17x8xf32>
    %cst_15 = arith.constant 0.353553385 : f32
    %51 = vector.broadcast %cst_15 : f32 to vector<17x8xf32>
    %52 = arith.mulf %48, %51 : vector<17x8xf32>
    %cst_16 = arith.constant dense<0.000000e+00> : vector<17x17xf32>
    %53 = tpu.matmul %52, %49, %cst_16 {dimension_numbers = #tpu.dot_dimension_numbers<[1], [1], [0], [0], [0, 0, 1, 0], [], []>} : vector<17x8xf32>, vector<17x8xf32>, vector<17x17xf32> -> vector<17x17xf32>
    %cst_17 = arith.constant dense<0xFF800000> : vector<17xf32>
    %54 = vector.multi_reduction <maximumf>, %53, %cst_17 [1] : vector<17x17xf32> to vector<17xf32>
    %55 = vector.shape_cast %54 : vector<17xf32> to vector<17x1xf32>
    %56 = vector.broadcast %55 : vector<17x1xf32> to vector<17x17xf32>
    %57 = arith.subf %53, %56 : vector<17x17xf32>
    %58 = math.exp %57 : vector<17x17xf32>
    %cst_18 = arith.constant dense<0.000000e+00> : vector<17xf32>
    %59 = vector.multi_reduction <add>, %58, %cst_18 [1] : vector<17x17xf32> to vector<17xf32>
    %60 = vector.shape_cast %59 : vector<17xf32> to vector<17x1xf32>
    %61 = tpu.reciprocal %60 {approx = true} : vector<17x1xf32> -> vector<17x1xf32>
    %cst_19 = arith.constant dense<0.000000e+00> : vector<17x8xf32>
    %62 = tpu.matmul %58, %50, %cst_19 {dimension_numbers = #tpu.dot_dimension_numbers<[1], [0], [0], [1], [0, 0, 1, 1], [], []>} : vector<17x17xf32>, vector<17x8xf32>, vector<17x8xf32> -> vector<17x8xf32>
    %63 = vector.broadcast %61 : vector<17x1xf32> to vector<17x8xf32>
    %64 = arith.mulf %62, %63 : vector<17x8xf32>
    %65 = tpu.iota {dimensions = array<i32: 0>} : vector<17x8xi32>
    %c1_i32_20 = arith.constant 1 : i32
    %66 = vector.broadcast %c1_i32_20 : i32 to vector<17x8xi32>
    %67 = arith.cmpi sge, %65, %66 : vector<17x8xi32>
    %68 = arith.addf %64, %48 : vector<17x8xf32>
    %69 = arith.select %67, %68, %64 : vector<17x8xi1>, vector<17x8xf32>
    %70 = vector.extract_strided_slice %3 {offsets = [0, 24], sizes = [17, 8], strides = [1, 1]} : vector<17x96xf32> to vector<17x8xf32>
    %71 = vector.extract_strided_slice %3 {offsets = [0, 56], sizes = [17, 8], strides = [1, 1]} : vector<17x96xf32> to vector<17x8xf32>
    %72 = vector.extract_strided_slice %3 {offsets = [0, 88], sizes = [17, 8], strides = [1, 1]} : vector<17x96xf32> to vector<17x8xf32>
    %cst_21 = arith.constant 0.353553385 : f32
    %73 = vector.broadcast %cst_21 : f32 to vector<17x8xf32>
    %74 = arith.mulf %70, %73 : vector<17x8xf32>
    %cst_22 = arith.constant dense<0.000000e+00> : vector<17x17xf32>
    %75 = tpu.matmul %74, %71, %cst_22 {dimension_numbers = #tpu.dot_dimension_numbers<[1], [1], [0], [0], [0, 0, 1, 0], [], []>} : vector<17x8xf32>, vector<17x8xf32>, vector<17x17xf32> -> vector<17x17xf32>
    %cst_23 = arith.constant dense<0xFF800000> : vector<17xf32>
    %76 = vector.multi_reduction <maximumf>, %75, %cst_23 [1] : vector<17x17xf32> to vector<17xf32>
    %77 = vector.shape_cast %76 : vector<17xf32> to vector<17x1xf32>
    %78 = vector.broadcast %77 : vector<17x1xf32> to vector<17x17xf32>
    %79 = arith.subf %75, %78 : vector<17x17xf32>
    %80 = math.exp %79 : vector<17x17xf32>
    %cst_24 = arith.constant dense<0.000000e+00> : vector<17xf32>
    %81 = vector.multi_reduction <add>, %80, %cst_24 [1] : vector<17x17xf32> to vector<17xf32>
    %82 = vector.shape_cast %81 : vector<17xf32> to vector<17x1xf32>
    %83 = tpu.reciprocal %82 {approx = true} : vector<17x1xf32> -> vector<17x1xf32>
    %cst_25 = arith.constant dense<0.000000e+00> : vector<17x8xf32>
    %84 = tpu.matmul %80, %72, %cst_25 {dimension_numbers = #tpu.dot_dimension_numbers<[1], [0], [0], [1], [0, 0, 1, 1], [], []>} : vector<17x17xf32>, vector<17x8xf32>, vector<17x8xf32> -> vector<17x8xf32>
    %85 = vector.broadcast %83 : vector<17x1xf32> to vector<17x8xf32>
    %86 = arith.mulf %84, %85 : vector<17x8xf32>
    %87 = tpu.iota {dimensions = array<i32: 0>} : vector<17x8xi32>
    %c1_i32_26 = arith.constant 1 : i32
    %88 = vector.broadcast %c1_i32_26 : i32 to vector<17x8xi32>
    %89 = arith.cmpi sge, %87, %88 : vector<17x8xi32>
    %90 = arith.addf %86, %70 : vector<17x8xf32>
    %91 = arith.select %89, %90, %86 : vector<17x8xi1>, vector<17x8xf32>
    %92 = tpu.concatenate %25, %47, %69, %91 in 1 : vector<17x8xf32>, vector<17x8xf32>, vector<17x8xf32>, vector<17x8xf32> -> vector<17x32xf32>
    %c0_27 = arith.constant 0 : index
    %c0_28 = arith.constant 0 : index
    %93 = vector.load %arg3[%c0_27, %c0_28] : memref<32x32xf32, #tpu.memory_space<vmem>>, vector<32x32xf32>
    %cst_29 = arith.constant dense<0.000000e+00> : vector<17x32xf32>
    %94 = tpu.matmul %92, %93, %cst_29 {dimension_numbers = #tpu.dot_dimension_numbers<[1], [0], [0], [1], [0, 0, 1, 1], [], []>} : vector<17x32xf32>, vector<32x32xf32>, vector<17x32xf32> -> vector<17x32xf32>
    %c0_30 = arith.constant 0 : index
    %c0_31 = arith.constant 0 : index
    %95 = vector.load %arg4[%c0_30, %c0_31] : memref<1x32xf32, #tpu.memory_space<vmem>>, vector<1x32xf32>
    %96 = vector.broadcast %95 : vector<1x32xf32> to vector<17x32xf32>
    %97 = arith.addf %94, %96 : vector<17x32xf32>
    %c0_32 = arith.constant 0 : index
    %c0_33 = arith.constant 0 : index
    %c0_34 = arith.constant 0 : index
    %98 = vector.load %arg5[%c0_32, %c0_33, %c0_34] : memref<1x17x32xf32, #tpu.memory_space<vmem>>, vector<1x17x32xf32>
    %99 = vector.shape_cast %98 : vector<1x17x32xf32> to vector<17x32xf32>
    %100 = vector.shape_cast %97 : vector<17x32xf32> to vector<1x17x32xf32>
    tpu.vector_store %arg5[%c0_32, %c0_33, %c0_34], %100 {strides = array<i32>} : memref<1x17x32xf32, #tpu.memory_space<vmem>>, vector<1x17x32xf32>,
    return
  }
  func.func @transform_0(%arg0: i32) -> (i32, i32, i32) {
    %c0_i32 = arith.constant 0 : i32
    %c0_i32_0 = arith.constant 0 : i32
    %c0_i32_1 = arith.constant 0 : i32
    return %arg0, %c0_i32, %c0_i32_0 : i32, i32, i32
  }
  func.func @transform_1(%arg0: i32) -> (i32, i32) {
    %c0_i32 = arith.constant 0 : i32
    %c0_i32_0 = arith.constant 0 : i32
    %c0_i32_1 = arith.constant 0 : i32
    return %c0_i32, %c0_i32_0 : i32, i32
  }
  func.func @transform_2(%arg0: i32) -> (i32, i32) {
    %c0_i32 = arith.constant 0 : i32
    %c0_i32_0 = arith.constant 0 : i32
    %c0_i32_1 = arith.constant 0 : i32
    return %c0_i32, %c0_i32_0 : i32, i32
  }
  func.func @transform_3(%arg0: i32) -> (i32, i32) {
    %c0_i32 = arith.constant 0 : i32
    %c0_i32_0 = arith.constant 0 : i32
    %c0_i32_1 = arith.constant 0 : i32
    return %c0_i32, %c0_i32_0 : i32, i32
  }
  func.func @transform_4(%arg0: i32) -> (i32, i32, i32) {
    %c0_i32 = arith.constant 0 : i32
    %c0_i32_0 = arith.constant 0 : i32
    %c0_i32_1 = arith.constant 0 : i32
    return %arg0, %c0_i32, %c0_i32_0 : i32, i32, i32
  }
}

</mosaic_0001>

<bundles_post_ra>
// kernel: tpu_custom_call.1
= control target key start
LH: loop header
LB: loop body
LE: loop exit
PB: predicated region body
PF: predicated region fallthrough
CT: control target
= control target key end

     0   :  { %s1168_s15 = smov 0   ;;  %s1445_s0 = inlined_call_operand.vmem [shape: f32[2,17,32], index: 0, kind: input, shape index: {}]   ;;  %s1446_s1 = inlined_call_operand.vmem [shape: f32[32,96], index: 1, kind: input, shape index: {}]   ;;  %s1447_s2 = inlined_call_operand.vmem [shape: f32[32,32], index: 2, kind: input, shape index: {}]   ;;  %s1448_s3 = inlined_call_operand.vmem [shape: f32[1,32], index: 3, kind: input, shape index: {}]   ;;  %s1449_s4 = inlined_call_operand.vmem [shape: f32[2,17,32], index: 4, kind: output, shape index: {}]  }
   0x1 LB: > { %s967_s16 = sadd.s32 4294967295, %s1127_s15   ;;  %p971_p0 = scmp.ge.s32.totalorder %s1127_s15, 1  ;;  %s1127_s15 = sphi %s1168_s15, %s14_s15  }
   0x2   : > { %p162_p1 = scmp.lt.s32.totalorder %s1127_s15, 3 }
   0x4   : > { %p163_p2 = pnand %p971_p0, %p162_p1 }
   0x5   : > { %p188_p3 = scmp.lt.s32.totalorder (!%p163_p2), %s967_s16, 1  ;;  %s1129_s29 = smov (!%p163_p2), 64  }
   0x6   : > { %166 = sbr.rel (%p163_p2) target bundleno = 1415 (0x587), region = 36  ;;  %s1130_s30 = smov (!%p163_p2), 96  }
   0x7   : > { %s1131_s5 = smov (!%p163_p2), 88   ;;  %s1132_s6 = smov (!%p163_p2), 120  }
   0x8   : > { %s1133_s7 = smov (!%p163_p2), 72   ;;  %s1134_s8 = smov (!%p163_p2), 80  }
   0x9   : > { %s1135_s9 = smov (!%p163_p2), 112   ;;  %s1136_s10 = smov (!%p163_p2), 56  }
   0xa   : > { %s1137_s11 = smov (!%p163_p2), 104   ;;  %s1138_s12 = smov (!%p163_p2), 40  }
   0xb   : > { %v204_v0 = vld [vmem:[%s1446_s1 + $0x18] sm:$0xff]  ;;  %v203_v1 = vld [vmem:[%s1446_s1 + $0x10] sm:$0xff]  ;;  %v202_v2 = vld [vmem:[%s1446_s1 + $0x8] sm:$0xff]  ;;  %s1451_s16 = smov (!%p188_p3, %s967_s16), 1  ;;  %vm205_vm0 = vcmask 261120   ;;  %vm344_vm1 = vcmask 1040384  }
   0xc   : > { %227 = vmatpush.msra.mxu0 %v204_v0  ;;  %1022 = vmatpush.msra.mxu1 %v204_v0  ;;  %v201_v3 = vld [vmem:[%s1446_s1] sm:$0xff]  ;;  %s1029_s25 = smul.u32 24, %s1451_s16  ;;  %vm253_vm2 = vcmask 64512   ;;  %vm295_vm3 = vcmask 138240   ;;  %vm302_vm4 = vcmask 131072   ;;  %s1139_s13 = smov 48  }
   0xd   : > { %s1140_s14 = smov 16   ;;  %s1141_s17 = smov 8   ;;  %vm857_vm6 = vcmask 130048   ;;  %vm861_vm7 = vcmask 195584   ;;  %vm910_vm8 = vcmask 253952  }
   0xe   : > { %228 = vmatpush.msra.mxu0 %v203_v1  ;;  %1023 = vmatpush.msra.mxu1 %v203_v1  ;;  %s192_s28 = scalar_lea.vmem %s1445_s0, %s1029_s25  ;;  %s1142_s18 = smov 24  }
   0xf   : > { %v198_v4 = vld [vmem:[%s192_s28] sm:$0xff]  ;;  %v200_v5 = vld [vmem:[%s192_s28 + $0x10] sm:$0x1]  ;;  %v199_v6 = vld [vmem:[%s192_s28 + $0x8] sm:$0xff] }
  0x10   : > { %229 = vmatpush.msra.mxu0 %v202_v2  ;;  %1024 = vmatpush.msra.mxu1 %v202_v2 }
  0x12   : > { %230 = vmatpush.msra.mxu0 %v201_v3  ;;  %1025 = vmatpush.msra.mxu1 %v201_v3 }
  0x13   : > { %974 = vmatmul.msk.f32.vlgmr.msra.gmra.mxu0 %vm205_vm0, %v198_v4  ;;  %976 = vmatmul.msk.f32.vlgmr.msra.gmra.mxu1 %vm205_vm0, %v200_v5 }
  0x1b   : > { %975 = vmatmul.msk.f32.gmra.mxu0 %vm205_vm0, %v199_v6 }
  0x90   : > { %v1199_v7 = vpop.f32.mrf.mxu0  ;;  %v1201_v8 = vpop.f32.mrf.mxu1 }
  0x91   : > { %331 = vrot.lane.b32.xlu2 %v1201_v8, %s1129_s29  ;;  %251 = vrot.lane.b32.xlu0 %v1201_v8, %s1130_s30  ;;  %v1218_v11 = vmul.f32 0.35355338, %v1199_v7  ;;  %v1223_v12 = vmul.f32 0.35355338, %v1201_v8 }
  0x92   : > { %247 = vrot.lane.b32.xlu1 %v1199_v7, %s1130_s30 }
  0x98   : > { %v1206_v9 = vpop.f32.mrf.mxu0 }
  0x99   : > { %249 = vrot.lane.b32.xlu0 %v1206_v9, %s1130_s30  ;;  %v1213_v10 = vpack.i.bf16 %v1199_v7, %v1206_v9  ;;  %v242_v18 = vmul.f32 0.35355338, %v1206_v9 }
  0xa1   : > { %399 = vrot.lane.b32.xlu0 %v1201_v8, %s1131_s5 }
  0xa9   : > { %395 = vrot.lane.b32.xlu0 %v1199_v7, %s1131_s5 }
  0xb1   : > { %1053 = vrot.lane.b32.xlu0 %v1213_v10, %s1129_s29 }
  0xb9   : > { %397 = vrot.lane.b32.xlu0 %v1206_v9, %s1131_s5 }
  0xc1   : > { %389 = vrot.lane.b32.xlu0 %v1218_v11, %s1132_s6 }
  0xc9   : > { %393 = vrot.lane.b32.xlu0 %v1223_v12, %s1132_s6 }
  0xd1   : > { %683 = vrot.lane.b32.xlu0 %v1206_v9, %s1133_s7 }
  0xd9   : > { %681 = vrot.lane.b32.xlu0 %v1199_v7, %s1133_s7 }
  0xe1   : > { %540 = vrot.lane.b32.xlu0 %v1206_v9, %s1134_s8 }
  0xe9   : > { %532 = vrot.lane.b32.xlu0 %v1218_v11, %s1135_s9 }
  0xeb   : > { %v332_v13 = vpop.permute.xlu2 %331 }
  0xec   : > { %983 = vmatpush.msk.msra.mxu2 %vm344_vm1, %v332_v13  ;;  %1026 = vmatpush.msk.msra.mxu3 %vm344_vm1, %v332_v13 }
  0xf1   : > { %536 = vrot.lane.b32.xlu0 %v1223_v12, %s1135_s9 }
  0xf9   : > { %473 = vrot.lane.b32.xlu0 %v1201_v8, %s1136_s10 }
 0x103   : > { %v252_v14 = vpop.permute.xlu0 %251 }
 0x104   : > { %977 = vmatpush.xpose.msk.msrb.mxu1 %vm253_vm2, %v252_v14  ;;  %v248_v16 = vpop.permute.xlu1 %247 }
 0x10b   : > { %v250_v15 = vpop.permute.xlu0 %249 }
 0x10c   : > { %978 = vmatpush.xpose.msk.msrb.mxu1 %vm253_vm2, %v250_v15 }
 0x110   : > { %979 = vmatpush.xpose.msk.msrb.mxu1 %vm253_vm2, %v248_v16 }
 0x113   : > { %980 = vmatmul.msk.f32.vlgmr.msrb.gmra.mxu1 %vm253_vm2, %v1218_v11  ;;  %v400_v17 = vpop.permute.xlu0 %399 }
 0x11b   : > { %v396_v19 = vpop.permute.xlu0 %395  ;;  %981 = vmatmul.msk.f32.gmra.mxu1 %vm253_vm2, %v242_v18 }
 0x123   : > { %v1054_v20 = vpop.permute.xlu0 %1053  ;;  %982 = vmatmul.msk.f32.gmra.mxu1 %vm253_vm2, %v1223_v12 }
 0x124   : > { %v1055_v21 = vunpack.i.l.bf16 %v1054_v20  ;;  %v1056_v22 = vunpack.i.h.bf16 %v1054_v20 }
 0x126   : > { %361 = vmatpush.msra.mxu2 %v1055_v21  ;;  %1027 = vmatpush.msra.mxu3 %v1055_v21 }
 0x128   : > { %362 = vmatpush.msra.mxu2 %v1056_v22  ;;  %1028 = vmatpush.msra.mxu3 %v1056_v22 }
 0x12a   : > { %987 = vmatpush.xpose.msk.msrb.mxu3 %vm253_vm2, %v400_v17 }
 0x12b   : > { %v398_v23 = vpop.permute.xlu0 %397 }
 0x12e   : > { %988 = vmatpush.xpose.msk.msrb.mxu3 %vm253_vm2, %v398_v23 }
 0x132   : > { %989 = vmatpush.xpose.msk.msrb.mxu3 %vm253_vm2, %v396_v19 }
 0x133   : > { %v390_v24 = vpop.permute.xlu0 %389 }
 0x13b   : > { %v394_v25 = vpop.permute.xlu0 %393 }
 0x143   : > { %v684_v26 = vpop.permute.xlu0 %683 }
 0x14b   : > { %v682_v27 = vpop.permute.xlu0 %681 }
 0x153   : > { %v541_v28 = vpop.permute.xlu0 %540 }
 0x15b   : > { %v533_v29 = vpop.permute.xlu0 %532 }
 0x163   : > { %v537_v30 = vpop.permute.xlu0 %536 }
 0x16b   : > { %v474_v31 = vpop.permute.xlu0 %473 }
 0x16c   : > { %993 = vmatpush.msk.msrb.mxu2 %vm344_vm1, %v474_v31 }
 0x190   : > { %v286_v32 = vpop.f32.mrf.mxu1 }
 0x191   : > { %v296_v37 = vsel %vm295_vm3, %v286_v32, -inf }
 0x198   : > { %v289_v33 = vpop.f32.mrf.mxu1 }
 0x199   : > { %v299_v34 = vsel %vm295_vm3, %v289_v33, -inf }
 0x19a   : > { %300 = vmax.xlane.f32.xlu1 %v299_v34 }
 0x1a0   : > { %v292_v35 = vpop.f32.mrf.mxu1 }
 0x1a1   : > { %v303_v36 = vsel %vm302_vm4, %v292_v35, -inf }
 0x1a2   : > { %304 = vmax.xlane.f32.xlu2 %v303_v36 }
 0x1b3   : > { %685 = vrot.lane.b32.xlu1 %v1201_v8, %s1133_s7 }
 0x1ba   : > { %391 = vrot.lane.b32.xlu2 %v242_v18, %s1132_s6 }
 0x1bb   : > { %675 = vrot.lane.b32.xlu1 %v1218_v11, %s1137_s11 }
 0x1c2   : > { %542 = vrot.lane.b32.xlu2 %v1201_v8, %s1134_s8 }
 0x1c3   : > { %677 = vrot.lane.b32.xlu1 %v242_v18, %s1137_s11 }
 0x1ca   : > { %538 = vrot.lane.b32.xlu2 %v1199_v7, %s1134_s8 }
 0x1cb   : > { %534 = vrot.lane.b32.xlu1 %v242_v18, %s1135_s9 }
 0x1d2   : > { %679 = vrot.lane.b32.xlu2 %v1223_v12, %s1137_s11 }
 0x1d3   : > { %759 = vrot.lane.b32.xlu1 %v1201_v8, %s1138_s12 }
 0x1fb   : > { %297 = vmax.xlane.f32.xlu2 %v296_v37 }
 0x20d   : > { %v301_v38 = vpop.xlane.xlu1 %300 }
 0x20e   : > { %v307_v39 = vsub.f32 %v289_v33, %v301_v38 }
 0x210   : > { %v311_v40 = vmul.f32 1.442695, %v307_v39 }
 0x212   : > { %1073 = vpow2.f32 %v311_v40 }
 0x213   : > { %1058 = vrot.lane.b32.xlu2 %v1213_v10, %s1136_s10 }
 0x215   : > { %v305_v41 = vpop.xlane.xlu2 %304 }
 0x216   : > { %v308_v42 = vsub.f32 %v292_v35, %v305_v41 }
 0x218   : > { %v1273_v43 = vpop.eup %1073  ;;  %v313_v44 = vmul.f32 1.442695, %v308_v42 }
 0x219   : > { %985 = vmatmul.msk.f32.vlgmr.msra.gmra.mxu3 %vm295_vm3, %v1273_v43 }
 0x21a   : > { %1075 = vpow2.f32 %v313_v44 }
 0x21b   : > { %1063 = vrot.lane.b32.xlu2 %v1213_v10, %s1138_s12 }
 0x21d   : > { %v392_v45 = vpop.permute.xlu2 %391 }
 0x220   : > { %v1278_v46 = vpop.eup %1075 }
 0x221   : > { %986 = vmatmul.msk.f32.gmra.mxu3 %vm295_vm3, %v1278_v46 }
 0x225   : > { %v686_v47 = vpop.permute.xlu1 %685  ;;  %v543_v48 = vpop.permute.xlu2 %542 }
 0x226   : > { %997 = vmatpush.xpose.msk.msrb.mxu0 %vm253_vm2, %v543_v48  ;;  %1007 = vmatpush.xpose.msk.msra.mxu3 %vm253_vm2, %v686_v47 }
 0x229   : > { %990 = vmatmul.msk.f32.vlgmr.msrb.gmra.mxu3 %vm253_vm2, %v390_v24 }
 0x22a   : > { %998 = vmatpush.xpose.msk.msrb.mxu0 %vm253_vm2, %v541_v28  ;;  %1008 = vmatpush.xpose.msk.msra.mxu3 %vm253_vm2, %v684_v26 }
 0x22d   : > { %v676_v49 = vpop.permute.xlu1 %675  ;;  %v539_v50 = vpop.permute.xlu2 %538 }
 0x22e   : > { %999 = vmatpush.xpose.msk.msrb.mxu0 %vm253_vm2, %v539_v50  ;;  %1009 = vmatpush.xpose.msk.msra.mxu3 %vm253_vm2, %v682_v27 }
 0x231   : > { %991 = vmatmul.msk.f32.gmra.mxu3 %vm253_vm2, %v392_v45  ;;  %1000 = vmatmul.msk.f32.vlgmr.msrb.gmra.mxu0 %vm253_vm2, %v533_v29 }
 0x235   : > { %v678_v51 = vpop.permute.xlu1 %677  ;;  %v680_v53 = vpop.permute.xlu2 %679 }
 0x239   : > { %992 = vmatmul.msk.f32.gmra.mxu3 %vm253_vm2, %v394_v25 }
 0x23d   : > { %v535_v52 = vpop.permute.xlu1 %534 }
 0x23e   : > { %1001 = vmatmul.msk.f32.gmra.mxu0 %vm253_vm2, %v535_v52 }
 0x241   : > { %1010 = vmatmul.msk.f32.vlgmr.msra.gmra.mxu3 %vm253_vm2, %v676_v49 }
 0x245   : > { %v760_v61 = vpop.permute.xlu1 %759 }
 0x246   : > { %1002 = vmatmul.msk.f32.gmra.mxu0 %vm253_vm2, %v537_v30 }
 0x249   : > { %1011 = vmatmul.msk.f32.gmra.mxu3 %vm253_vm2, %v678_v51 }
 0x251   : > { %1012 = vmatmul.msk.f32.gmra.mxu3 %vm253_vm2, %v680_v53 }
 0x26e   : > { %v298_v54 = vpop.xlane.xlu2 %297 }
 0x26f   : > { %v306_v55 = vsub.f32 %v286_v32, %v298_v54 }
 0x271   : > { %v309_v56 = vmul.f32 1.442695, %v306_v55 }
 0x273   : > { %1077 = vpow2.f32 %v309_v56 }
 0x276   : > { %v1059_v57 = vpop.permute.xlu2 %1058 }
 0x277   : > { %v1060_v58 = vunpack.i.l.bf16 %v1059_v57  ;;  %v1061_v60 = vunpack.i.h.bf16 %v1059_v57  ;;  %v318_v57 = vsel %vm295_vm3, %v1273_v43, 0.0 }
 0x279   : > { %v1297_v59 = vpop.eup %1077  ;;  %502 = vmatpush.msrb.mxu2 %v1060_v58 }
 0x27a   : > { %984 = vmatmul.msk.f32.vlgmr.msra.gmra.mxu2 %vm295_vm3, %v1297_v59 }
 0x27b   : > { %503 = vmatpush.msrb.mxu2 %v1061_v60 }
 0x27d   : > { %1013 = vmatpush.msk.msra.mxu2 %vm344_vm1, %v760_v61 }
 0x27e   : > { %v1064_v62 = vpop.permute.xlu2 %1063 }
 0x27f   : > { %v1065_v63 = vunpack.i.l.bf16 %v1064_v62  ;;  %v1066_v0 = vunpack.i.h.bf16 %v1064_v62 }
 0x281   : > { %788 = vmatpush.msra.mxu2 %v1065_v63 }
 0x283   : > { %789 = vmatpush.msra.mxu2 %v1066_v0 }
 0x29c   : > { %v1302_v1 = vpop.f32.mrf.mxu3 }
 0x2a4   : > { %v1304_v2 = vpop.f32.mrf.mxu3 }
 0x2ac   : > { %v430_v3 = vpop.f32.mrf.mxu3 }
 0x2ad   : > { %v439_v4 = vsel %vm295_vm3, %v430_v3, -inf }
 0x2ae   : > { %440 = vmax.xlane.f32.xlu1 %v439_v4  ;;  %v573_v5 = vpop.f32.mrf.mxu0 }
 0x2af   : > { %v582_v6 = vsel %vm295_vm3, %v573_v5, -inf }
 0x2b0   : > { %583 = vmax.xlane.f32.xlu0 %v582_v6 }
 0x2b4   : > { %v433_v11 = vpop.f32.mrf.mxu3 }
 0x2b5   : > { %v442_v12 = vsel %vm295_vm3, %v433_v11, -inf }
 0x2b8   : > { %443 = vmax.xlane.f32.xlu0 %v442_v12 }
 0x2bb   : > { %v576_v13 = vpop.f32.mrf.mxu0 }
 0x2bc   : > { %v436_v14 = vpop.f32.mrf.mxu3  ;;  %v585_v15 = vsel %vm295_vm3, %v576_v13, -inf }
 0x2bd   : > { %586 = vmax.xlane.f32.xlu2 %v585_v15  ;;  %v445_v16 = vsel %vm302_vm4, %v436_v14, -inf }
 0x2be   : > { %446 = vmax.xlane.f32.xlu1 %v445_v16  ;;  %v376_v16 = vlaneseq }
 0x2c3   : > { %v1322_v23 = vpop.f32.mrf.mxu0 }
 0x2c4   : > { %v716_v17 = vpop.f32.mrf.mxu3  ;;  %v588_v24 = vsel %vm302_vm4, %v1322_v23, -inf }
 0x2c5   : > { %v725_v18 = vsel %vm295_vm3, %v716_v17, -inf }
 0x2c6   : > { %726 = vmax.xlane.f32.xlu1 %v725_v18 }
 0x2cc   : > { %616 = vrot.lane.b32.xlu0 %v1201_v8, %s1139_s13  ;;  %v1314_v19 = vpop.f32.mrf.mxu3 }
 0x2cd   : > { %v728_v20 = vsel %vm295_vm3, %v1314_v19, -inf }
 0x2d4   : > { %v1318_v21 = vpop.f32.mrf.mxu3 }
 0x2d5   : > { %v731_v22 = vsel %vm302_vm4, %v1318_v21, -inf }
 0x2df   : > { %1068 = vrot.lane.b32.xlu1 %v1213_v10, %s1139_s13 }
 0x2f6   : > { %729 = vmax.xlane.f32.xlu0 %v728_v20 }
 0x2fe   : > { %732 = vmax.xlane.f32.xlu0 %v731_v22 }
 0x309   : > { %589 = vmax.xlane.f32.xlu1 %v588_v24  ;;  %v315_v24 = vsel %vm295_vm3, %v1297_v59, 0.0 }
 0x312   : > { %660 = vrot.lane.b32.xlu0 %v1199_v7, %s1135_s9 }
 0x321   : > { %v441_v10 = vpop.xlane.xlu1 %440 }
 0x322   : > { %v448_v25 = vsub.f32 %v430_v3, %v441_v10  ;;  %517 = vrot.lane.b32.xlu1 %v1199_v7, %s1132_s6 }
 0x323   : > { %v584_v26 = vpop.xlane.xlu0 %583 }
 0x324   : > { %v451_v27 = vmul.f32 1.442695, %v448_v25  ;;  %v591_v28 = vsub.f32 %v573_v5, %v584_v26 }
 0x326   : > { %1079 = vpow2.f32 %v451_v27  ;;  %v594_v29 = vmul.f32 1.442695, %v591_v28 }
 0x328   : > { %1081 = vpow2.f32 %v594_v29 }
 0x32a   : > { %662 = vrot.lane.b32.xlu1 %v1206_v9, %s1135_s9 }
 0x32b   : > { %v444_v30 = vpop.xlane.xlu0 %443 }
 0x32c   : > { %v1332_v31 = vpop.eup %1079  ;;  %v449_v32 = vsub.f32 %v433_v11, %v444_v30  ;;  %v321_v30 = vsel %vm302_vm4, %v1278_v46, 0.0  ;;  %v1389_v46 = vpop.f32.mrf.mxu2 }
 0x32d   : > { %994 = vmatmul.msk.f32.vlgmr.msrb.gmra.mxu2 %vm295_vm3, %v1332_v31 }
 0x32e   : > { %v1082_v33 = vpop.eup %1081  ;;  %v453_v34 = vmul.f32 1.442695, %v449_v32 }
 0x32f   : > { %v600_v35 = vsel %vm295_vm3, %v1082_v33, 0.0 }
 0x330   : > { %1083 = vpow2.f32 %v453_v34  ;;  %601 = vadd.xlane.f32.xlu2 %v600_v35  ;;  %v587_v36 = vpop.xlane.xlu2 %586 }
 0x331   : > { %v592_v37 = vsub.f32 %v576_v13, %v587_v36  ;;  %v447_v38 = vpop.xlane.xlu1 %446  ;;  %v457_v13 = vsel %vm295_vm3, %v1332_v31, 0.0 }
 0x332   : > { %v450_v39 = vsub.f32 %v436_v14, %v447_v38  ;;  %664 = vrot.lane.b32.xlu1 %v1201_v8, %s1135_s9 }
 0x333   : > { %v596_v40 = vmul.f32 1.442695, %v592_v37 }
 0x334   : > { %v455_v41 = vmul.f32 1.442695, %v450_v39 }
 0x335   : > { %1085 = vpow2.f32 %v596_v40 }
 0x336   : > { %v1084_v42 = vpop.eup %1083  ;;  %1087 = vpow2.f32 %v455_v41 }
 0x337   : > { %995 = vmatmul.msk.f32.gmra.mxu2 %vm295_vm3, %v1084_v42  ;;  %v460_v15 = vsel %vm295_vm3, %v1084_v42, 0.0 }
 0x339   : > { %v727_v44 = vpop.xlane.xlu1 %726 }
 0x33a   : > { %v734_v45 = vsub.f32 %v716_v17, %v727_v44  ;;  %v1372_v17 = vshrl.u32 %v376_v16, 7 }
 0x33b   : > { %v1086_v47 = vpop.eup %1085 }
 0x33c   : > { %v737_v48 = vmul.f32 1.442695, %v734_v45  ;;  %v603_v49 = vsel %vm295_vm3, %v1086_v47, 0.0  ;;  %v1088_v50 = vpop.eup %1087  ;;  %vm380_vm5 = vcmp.ge.s32.totalorder %v1372_v17, 1 }
 0x33d   : > { %604 = vadd.xlane.f32.xlu2 %v603_v49  ;;  %v463_v56 = vsel %vm302_vm4, %v1088_v50, 0.0 }
 0x33e   : > { %v617_v51 = vpop.permute.xlu0 %616  ;;  %1089 = vpow2.f32 %v737_v48 }
 0x33f   : > { %996 = vmatmul.msk.f32.gmra.mxu2 %vm295_vm3, %v1088_v50  ;;  %1003 = vmatpush.msk.msra.mxu1 %vm344_vm1, %v617_v51 }
 0x344   : > { %v1343_v52 = vpop.eup %1089 }
 0x345   : > { %v743_v32 = vsel %vm295_vm3, %v1343_v52, 0.0 }
 0x347   : > { %1014 = vmatmul.msk.f32.vlgmr.msra.gmra.mxu2 %vm295_vm3, %v1343_v52 }
 0x351   : > { %v1069_v53 = vpop.permute.xlu1 %1068 }
 0x352   : > { %v1070_v54 = vunpack.i.l.bf16 %v1069_v53  ;;  %v1071_v55 = vunpack.i.h.bf16 %v1069_v53 }
 0x354   : > { %645 = vmatpush.msra.mxu1 %v1070_v54 }
 0x355   : > { %803 = vrot.lane.b32.xlu2 %v1199_v7, %s1137_s11 }
 0x356   : > { %646 = vmatpush.msra.mxu1 %v1071_v55 }
 0x357   : > { %1004 = vmatmul.msk.f32.vlgmr.msra.gmra.mxu1 %vm295_vm3, %v1082_v33 }
 0x35c   : > { %464 = vadd.xlane.f32.xlu1 %v463_v56 }
 0x35d   : > { %519 = vrot.lane.b32.xlu2 %v1206_v9, %s1132_s6 }
 0x35f   : > { %1005 = vmatmul.msk.f32.gmra.mxu1 %vm295_vm3, %v1086_v47 }
 0x364   : > { %319 = vadd.xlane.f32.xlu1 %v318_v57 }
 0x365   : > { %807 = vrot.lane.b32.xlu2 %v1201_v8, %s1137_s11 }
 0x369   : > { %v730_v58 = vpop.xlane.xlu0 %729 }
 0x36a   : > { %v735_v60 = vsub.f32 %v1314_v19, %v730_v58 }
 0x36c   : > { %v739_v61 = vmul.f32 1.442695, %v735_v60 }
 0x36e   : > { %1091 = vpow2.f32 %v739_v61 }
 0x371   : > { %v733_v62 = vpop.xlane.xlu0 %732 }
 0x372   : > { %v736_v63 = vsub.f32 %v1318_v21, %v733_v62 }
 0x374   : > { %v1092_v0 = vpop.eup %1091  ;;  %v741_v3 = vmul.f32 1.442695, %v736_v63 }
 0x375   : > { %1015 = vmatmul.msk.f32.gmra.mxu2 %vm295_vm3, %v1092_v0  ;;  %v746_v34 = vsel %vm295_vm3, %v1092_v0, 0.0 }
 0x376   : > { %1093 = vpow2.f32 %v741_v3 }
 0x37c   : > { %v1094_v4 = vpop.eup %1093  ;;  %v590_v5 = vpop.xlane.xlu1 %589 }
 0x37d   : > { %v593_v43 = vsub.f32 %v1322_v23, %v590_v5  ;;  %1016 = vmatmul.msk.f32.gmra.mxu2 %vm295_vm3, %v1094_v4  ;;  %v749_v36 = vsel %vm302_vm4, %v1094_v4, 0.0 }
 0x37f   : > { %v598_v6 = vmul.f32 1.442695, %v593_v43 }
 0x381   : > { %1095 = vpow2.f32 %v598_v6 }
 0x384   : > { %v661_v23 = vpop.permute.xlu0 %660 }
 0x387   : > { %v1096_v11 = vpop.eup %1095 }
 0x388   : > { %1006 = vmatmul.msk.f32.gmra.mxu1 %vm295_vm3, %v1096_v11  ;;  %v606_v12 = vsel %vm302_vm4, %v1096_v11, 0.0 }
 0x389   : > { %607 = vadd.xlane.f32.xlu0 %v606_v12 }
 0x38e   : > { %458 = vadd.xlane.f32.xlu2 %v457_v13 }
 0x394   : > { %v518_v20 = vpop.permute.xlu1 %517 }
 0x39c   : > { %v663_v29 = vpop.permute.xlu1 %662 }
 0x39d   : > { %805 = vrot.lane.b32.xlu0 %v1206_v9, %s1137_s11 }
 0x3a3   : > { %v602_v14 = vpop.xlane.xlu2 %601 }
 0x3a4   : > { %1097 = vrcp.f32 %v602_v14  ;;  %v665_v54 = vpop.permute.xlu1 %664  ;;  %v868_v14 = vld [vmem:[%s1447_s2 + $0x18] sm:$0xff] }
 0x3a5   : > { %521 = vrot.lane.b32.xlu0 %v1201_v8, %s1132_s6  ;;  %894 = vmatpush.msra.mxu0 %v868_v14  ;;  %s197_s6 = scalar_lea.vmem %s1449_s4, %s1029_s25 }
 0x3aa   : > { %v1098_v19 = vpop.eup %1097 }
 0x3b0   : > { %v605_v18 = vpop.xlane.xlu2 %604  ;;  %v505_v39 = vpop.f32.mrf.mxu2 }
 0x3b1   : > { %1099 = vrcp.f32 %v605_v18  ;;  %v866_v18 = vld [vmem:[%s1447_s2 + $0x8] sm:$0xff] }
 0x3b7   : > { %v1100_v26 = vpop.eup %1099 }
 0x3b8   : > { %v804_v59 = vpop.permute.xlu2 %803 }
 0x3ba   : > { %v508_v50 = vpop.f32.mrf.mxu2 }
 0x3c0   : > { %v520_v33 = vpop.permute.xlu2 %519 }
 0x3c2   : > { %v511_v55 = vpop.f32.mrf.mxu2 }
 0x3c8   : > { %v1386_v35 = vpop.permute.xlu2 %807 }
 0x3ca   : > { %v791_v60 = vpop.f32.mrf.mxu2 }
 0x3cf   : > { %461 = vadd.xlane.f32.xlu0 %v460_v15  ;;  %v465_v57 = vpop.xlane.xlu1 %464  ;;  %v867_v15 = vld [vmem:[%s1447_s2 + $0x10] sm:$0xff] }
 0x3d0   : > { %895 = vmatpush.msra.mxu0 %v867_v15 }
 0x3d2   : > { %896 = vmatpush.msra.mxu0 %v866_v18 }
 0x3d4   : > { %v648_v21 = vpop.f32.mrf.mxu1 }
 0x3d5   : > { %v657_v22 = vmul.f32 %v1098_v19, %v648_v21 }
 0x3d7   : > { %v669_v10 = vadd.f32 %v661_v23, %v657_v22  ;;  %316 = vadd.xlane.f32.xlu0 %v315_v24 }
 0x3d9   : > { %v672_v25 = vsel %vm380_vm5, %v669_v10, %v657_v22 }
 0x3da   : > { %833 = vrot.lane.b32.xlu2 %v672_v25, %s1140_s14  ;;  %v865_v25 = vld [vmem:[%s1447_s2] sm:$0xff] }
 0x3db   : > { %897 = vmatpush.msra.mxu0 %v865_v25 }
 0x3dc   : > { %v651_v27 = vpop.f32.mrf.mxu1 }
 0x3dd   : > { %v658_v28 = vmul.f32 %v1100_v26, %v651_v27 }
 0x3df   : > { %v670_v31 = vadd.f32 %v663_v29, %v658_v28  ;;  %322 = vadd.xlane.f32.xlu0 %v321_v30 }
 0x3e1   : > { %835 = vrot.lane.b32.xlu1 %v670_v31, %s1140_s14 }
 0x3f8   : > { %v794_v5 = vpop.f32.mrf.mxu2 }
 0x3fc   : > { %v608_v42 = vpop.xlane.xlu0 %607 }
 0x400   : > { %v797_v23 = vpop.f32.mrf.mxu2 }
 0x401   : > { %v459_v37 = vpop.xlane.xlu2 %458 }
 0x402   : > { %1101 = vrcp.f32 %v459_v37 }
 0x403   : > { %744 = vadd.xlane.f32.xlu2 %v743_v32 }
 0x405   : > { %v654_v16 = vpop.f32.mrf.mxu1 }
 0x408   : > { %v1102_v38 = vpop.eup %1101 }
 0x409   : > { %v514_v40 = vmul.f32 %v1102_v38, %v505_v39 }
 0x40b   : > { %747 = vadd.xlane.f32.xlu2 %v746_v34  ;;  %v526_v41 = vadd.f32 %v518_v20, %v514_v40 }
 0x40d   : > { %v529_v44 = vsel %vm380_vm5, %v526_v41, %v514_v40 }
 0x40f   : > { %v806_v45 = vpop.permute.xlu0 %805 }
 0x413   : > { %750 = vadd.xlane.f32.xlu2 %v749_v36  ;;  %v320_v36 = vpop.xlane.xlu1 %319 }
 0x417   : > { %v522_v47 = vpop.permute.xlu0 %521 }
 0x42b   : > { %821 = vrot.lane.b32.xlu2 %v529_v44, %s1141_s17 }
 0x434   : > { %v834_v53 = vpop.permute.xlu2 %833 }
 0x442   : > { %v462_v48 = vpop.xlane.xlu0 %461 }
 0x443   : > { %1103 = vrcp.f32 %v462_v48 }
 0x449   : > { %v1104_v49 = vpop.eup %1103 }
 0x44a   : > { %v515_v51 = vmul.f32 %v1104_v49, %v508_v50  ;;  %v317_v26 = vpop.xlane.xlu0 %316 }
 0x44c   : > { %v527_v52 = vadd.f32 %v520_v33, %v515_v51 }
 0x44e   : > { %823 = vrot.lane.b32.xlu2 %v527_v52, %s1141_s17  ;;  %v1072_v52 = vld [vmem:[%s1448_s3] ss:$0 sm:$0xff] }
 0x476   : > { %v745_v56 = vpop.xlane.xlu2 %744 }
 0x477   : > { %1105 = vrcp.f32 %v745_v56 }
 0x478   : > { %1107 = vrcp.f32 %v465_v57 }
 0x47d   : > { %v1106_v58 = vpop.eup %1105 }
 0x47e   : > { %v748_v61 = vpop.xlane.xlu2 %747  ;;  %v800_v62 = vmul.f32 %v1106_v58, %v791_v60  ;;  %v1108_v3 = vpop.eup %1107 }
 0x47f   : > { %1109 = vrcp.f32 %v748_v61  ;;  %v516_v6 = vmul.f32 %v1108_v3, %v511_v55 }
 0x480   : > { %v812_v63 = vadd.f32 %v804_v59, %v800_v62  ;;  %1111 = vrcp.f32 %v608_v42  ;;  %v836_v42 = vpop.permute.xlu1 %835 }
 0x481   : > { %v528_v12 = vadd.f32 %v522_v47, %v516_v6 }
 0x482   : > { %v815_v0 = vsel %vm380_vm5, %v812_v63, %v800_v62 }
 0x483   : > { %845 = vrot.lane.b32.xlu2 %v815_v0, %s1142_s18 }
 0x485   : > { %v1110_v4 = vpop.eup %1109 }
 0x486   : > { %v801_v43 = vmul.f32 %v1110_v4, %v794_v5  ;;  %v751_v13 = vpop.xlane.xlu2 %750  ;;  %v1112_v19 = vpop.eup %1111 }
 0x487   : > { %1113 = vrcp.f32 %v751_v13  ;;  %v659_v20 = vmul.f32 %v1112_v19, %v654_v16 }
 0x488   : > { %v813_v11 = vadd.f32 %v806_v45, %v801_v43  ;;  %1115 = vrcp.f32 %v317_v26 }
 0x489   : > { %v671_v21 = vadd.f32 %v665_v54, %v659_v20  ;;  %1117 = vrcp.f32 %v320_v36 }
 0x48a   : > { %847 = vrot.lane.b32.xlu0 %v813_v11, %s1142_s18 }
 0x48b   : > { %825 = vrot.lane.b32.xlu2 %v528_v12, %s1141_s17 }
 0x48d   : > { %v1114_v22 = vpop.eup %1113 }
 0x48e   : > { %v802_v24 = vmul.f32 %v1114_v22, %v797_v23  ;;  %v822_v27 = vpop.permute.xlu2 %821  ;;  %v1116_v28 = vpop.eup %1115 }
 0x48f   : > { %v373_v29 = vmul.f32 %v1116_v28, %v1389_v46  ;;  %v1118_v46 = vpop.eup %1117 }
 0x490   : > { %v814_v10 = vadd.f32 %v1386_v35, %v802_v24  ;;  %v374_v38 = vmul.f32 %v1118_v46, %v1302_v1 }
 0x491   : > { %v383_v30 = vadd.f32 %v373_v29, %v1199_v7  ;;  %v323_v7 = vpop.xlane.xlu0 %322 }
 0x492   : > { %1119 = vrcp.f32 %v323_v7  ;;  %v384_v17 = vadd.f32 %v374_v38, %v1206_v9 }
 0x493   : > { %837 = vrot.lane.b32.xlu2 %v671_v21, %s1140_s14  ;;  %v386_v59 = vsel %vm380_vm5, %v383_v30, %v373_v29 }
 0x494   : > { %v854_v32 = vsel %vm253_vm2, %v386_v59, %v822_v27 }
 0x495   : > { %v858_v33 = vsel %vm857_vm6, %v854_v32, %v834_v53 }
 0x498   : > { %v1120_v41 = vpop.eup %1119 }
 0x499   : > { %v375_v47 = vmul.f32 %v1120_v41, %v1304_v2 }
 0x49b   : > { %849 = vrot.lane.b32.xlu2 %v814_v10, %s1142_s18  ;;  %v385_v1 = vadd.f32 %v375_v47, %v1201_v8 }
 0x4a8   : > { %v824_v31 = vpop.permute.xlu2 %823 }
 0x4a9   : > { %v855_v40 = vsel %vm253_vm2, %v384_v17, %v824_v31 }
 0x4aa   : > { %v859_v45 = vsel %vm857_vm6, %v855_v40, %v836_v42 }
 0x4dd   : > { %v846_v34 = vpop.permute.xlu2 %845 }
 0x4de   : > { %v862_v35 = vsel %vm861_vm7, %v858_v33, %v846_v34 }
 0x4df   : > { %1017 = vmatmul.msk.f32.vlgmr.msra.gmra.mxu0 %vm205_vm0, %v862_v35 }
 0x4e5   : > { %v826_v37 = vpop.permute.xlu2 %825 }
 0x4e6   : > { %v856_v9 = vsel %vm253_vm2, %v385_v1, %v826_v37 }
 0x4ed   : > { %v838_v39 = vpop.permute.xlu2 %837 }
 0x4ee   : > { %v860_v50 = vsel %vm857_vm6, %v856_v9, %v838_v39 }
 0x4f5   : > { %v850_v49 = vpop.permute.xlu2 %849 }
 0x4f6   : > { %v864_v51 = vsel %vm861_vm7, %v860_v50, %v850_v49 }
 0x4fc   : > { %v848_v44 = vpop.permute.xlu0 %847 }
 0x4fd   : > { %v863_v48 = vsel %vm861_vm7, %v859_v45, %v848_v44 }
 0x4fe   : > { %1018 = vmatmul.msk.f32.gmra.mxu0 %vm205_vm0, %v863_v48 }
 0x506   : > { %1019 = vmatmul.msk.f32.gmra.mxu0 %vm205_vm0, %v864_v51 }
 0x55c   : > { %v899_v2 = vpop.f32.mrf.mxu0 }
 0x55d   : > { %v900_v8 = vadd.f32 %v1072_v52, %v899_v2 }
 0x55f   : > { %908 = vst.msk [vmem:[%s197_s6] sm:$0xff] %vm205_vm0, %v900_v8 }
 0x57b   : > { %v902_v53 = vpop.f32.mrf.mxu0 }
 0x57c   : > { %v903_v54 = vadd.f32 %v1072_v52, %v902_v53 }
 0x57e   : > { %909 = vst.msk [vmem:[%s197_s6 + $0x8] sm:$0xff] %vm205_vm0, %v903_v54 }
 0x583   : > { %v905_v55 = vpop.f32.mrf.mxu0 }
 0x584   : > { %v906_v56 = vadd.f32 %v1072_v52, %v905_v55 }
 0x586   : > { %911 = vst.msk [vmem:[%s197_s6 + $0x10] sm:$0x1] %vm910_vm8, %v906_v56 }
 0x587 PF: > { %s14_s15 = sadd.s32 1, %s1127_s15  }
 0x588   : > { %p11_p4 = scmp.ge.s32.totalorder %s14_s15, 4  }
 0x58a   :  { %13 = sbr.rel (!%p11_p4) target bundleno = 1 (0x1), region = 66 }

</bundles_post_ra>
